<compile_context>
chip_gen: v7x
topology: tpu7x:2x2x1
jax: 0.10.0
libtpu: 0.0.40
codegen_flags: <defaults>
</compile_context>

<pallas_src>
import numpy as np
import jax
import jax.numpy as jnp
from jax.experimental import pallas as pl
from jax.experimental.pallas import tpu as pltpu


def _map_kernel(x_ref, m2_ref, a_ref, b_ref, o_ref):
    """One grid step = one batch element (all C channels at once).

    x_ref : (1, C, HW)   real images, row-major flattened spatial dims
    m2_ref: (C, 2*HW)    frequency mask, duplicated as [m | m]
    a_ref : (HW, 2*HW)   real-embedded forward DFT  [Re(Kf) | Im(Kf)]
    b_ref : (2*HW, HW)   real-embedded inverse DFT  [Re(Ki); -Im(Ki)]
    o_ref : (1, C, HW)   real output
    """
    x = x_ref[0]                                                   # (C, HW)
    # Forward 2-D DFT: spectrum real/imag parts side by side.
    s = jnp.dot(x, a_ref[...], preferred_element_type=jnp.float32)  # (C, 2HW)
    # Frequency-domain modulation (mask is real, same for Re and Im halves).
    y = s * m2_ref[...]                                            # (C, 2HW)
    # Inverse 2-D DFT, real part only.
    o_ref[0] = jnp.dot(y, b_ref[...], preferred_element_type=jnp.float32)


def _kron_dft_mats(H, W):
    """Real-embedded Kronecker (I)DFT matrices (host-side, float32)."""
    def dft(n, inverse):
        k = np.arange(n)
        ang = 2.0 * np.pi * np.outer(k, k) / n
        if inverse:
            return (np.cos(ang) + 1j * np.sin(ang)) / n      # exp(+2πi kk'/n)/n
        return np.cos(ang) - 1j * np.sin(ang)                # exp(-2πi kk'/n)

    kf = np.kron(dft(H, False), dft(W, False))               # (HW, HW) complex
    ki = np.kron(dft(H, True), dft(W, True))                 # (HW, HW) complex
    # x real:  [Sr | Si] = x @ [Re(kf) | Im(kf)]
    a = np.concatenate([kf.real, kf.imag], axis=1)           # (HW, 2HW)
    # Re((Yr + iYi) @ ki) = Yr @ Re(ki) - Yi @ Im(ki)
    b = np.concatenate([ki.real, -ki.imag], axis=0)          # (2HW, HW)
    return jnp.asarray(a, jnp.float32), jnp.asarray(b, jnp.float32)


def map_forward(x, M):
    """x: (B, C, H, W) real. M: (1, C, H, W) real mask. Returns (B, C, H, W) f32."""
    B, C, H, W = x.shape
    assert M.shape == (1, C, H, W)
    HW = H * W

    a_mat, b_mat = _kron_dft_mats(H, W)                      # (HW,2HW), (2HW,HW)

    xf = x.reshape(B, C, HW).astype(jnp.float32)             # row-major flatten
    m = M.reshape(C, HW).astype(jnp.float32)
    m2 = jnp.concatenate([m, m], axis=-1)                    # (C, 2HW), no batch copy

    img_spec = pl.BlockSpec((1, C, HW), lambda b: (b, 0, 0))

    out = pl.pallas_call(
        _map_kernel,
        out_shape=jax.ShapeDtypeStruct((B, C, HW), jnp.float32),
        grid_spec=pl.GridSpec(
            grid=(B,),
            in_specs=[
                img_spec,                                    # x
                pl.BlockSpec((C, 2 * HW), lambda b: (0, 0)),  # mask (resident)
                pl.BlockSpec((HW, 2 * HW), lambda b: (0, 0)),  # fwd DFT (resident)
                pl.BlockSpec((2 * HW, HW), lambda b: (0, 0)),  # inv DFT (resident)
            ],
            out_specs=img_spec,
        ),
        compiler_params=pltpu.CompilerParams(
            dimension_semantics=("parallel",),
            # Plenty of headroom at these sizes; revisit (K-tile the DFT matmuls)
            # only if H, W grow toward ~512+ (v7x has 64 MiB physical VMEM).
            vmem_limit_bytes=64 * 1024 * 1024,
        ),
    )(xf, m2, a_mat, b_mat)

    return out.reshape(B, C, H, W)


def masked_clf_forward(x, M, clf=None):
    """MaskedClf.forward: x -> clf(map(x))."""
    # TODO(synk): `clf` is an arbitrary user-supplied pre-trained classifier with no architecture in the spec; left as a pluggable callable (identity by default) rather than faking one.
    y = map_forward(x, M)
    return clf(y) if clf is not None else y


if __name__ == "__main__":
    # Small shapes consistent with the module: map_size=(C, H, W)=(4, 16, 16), batch=2.
    B, C, H, W = 2, 4, 16, 16
    key = jax.random.PRNGKey(0)
    x = jax.random.normal(key, (B, C, H, W), dtype=jnp.float32)

    # Deterministic parameter init (matches nn.init.ones_ on the mask).
    M = jnp.ones((1, C, H, W), dtype=jnp.float32)

    y = masked_clf_forward(x, M)
    y = jax.block_until_ready(y)

    # Reference: same math with jnp.fft.
    ref = jnp.real(jnp.fft.ifft2(M * jnp.fft.fft2(x)))
    assert y.shape == (B, C, H, W) and y.dtype == jnp.float32
    np.testing.assert_allclose(np.asarray(y), np.asarray(ref), atol=1e-3, rtol=1e-3)

    print("KERNEL_OK")
</pallas_src>

<mosaic_0001>
module attributes {stable_mosaic.version = 11 : i64} {
  func.func @_map_kernel(%arg0: i32, %arg1: memref<1x4x256xf32, #tpu.memory_space<vmem>>, %arg2: memref<4x512xf32, #tpu.memory_space<vmem>>, %arg3: memref<256x512xf32, #tpu.memory_space<vmem>>, %arg4: memref<512x256xf32, #tpu.memory_space<vmem>>, %arg5: memref<1x4x256xf32, #tpu.memory_space<vmem>>) attributes {dimension_semantics = [#tpu.dimension_semantics<parallel>], iteration_bounds = array<i64: 2>, scalar_prefetch = 0 : i64, scratch_operands = 0 : i64, tpu.core_type = #tpu.core_type<tc>, window_params = [{transform_indices = @transform_0, window_bounds = array<i64: 1, 4, 256>}, {pipeline_mode = #tpu.pipeline_mode<synchronous>, transform_indices = @transform_1, window_bounds = array<i64: 4, 512>}, {pipeline_mode = #tpu.pipeline_mode<synchronous>, transform_indices = @transform_2, window_bounds = array<i64: 256, 512>}, {pipeline_mode = #tpu.pipeline_mode<synchronous>, transform_indices = @transform_3, window_bounds = array<i64: 512, 256>}, {transform_indices = @transform_4, window_bounds = array<i64: 1, 4, 256>}]} {
    %c0 = arith.constant 0 : index
    %c0_0 = arith.constant 0 : index
    %c0_1 = arith.constant 0 : index
    %0 = vector.load %arg1[%c0, %c0_0, %c0_1] : memref<1x4x256xf32, #tpu.memory_space<vmem>>, vector<1x4x256xf32>
    %1 = vector.shape_cast %0 : vector<1x4x256xf32> to vector<4x256xf32>
    %c0_2 = arith.constant 0 : index
    %c0_3 = arith.constant 0 : index
    %2 = vector.load %arg3[%c0_2, %c0_3] : memref<256x512xf32, #tpu.memory_space<vmem>>, vector<256x512xf32>
    %cst = arith.constant dense<0.000000e+00> : vector<4x512xf32>
    %3 = tpu.matmul %1, %2, %cst {dimension_numbers = #tpu.dot_dimension_numbers<[1], [0], [0], [1], [0, 0, 1, 1], [], []>} : vector<4x256xf32>, vector<256x512xf32>, vector<4x512xf32> -> vector<4x512xf32>
    %c0_4 = arith.constant 0 : index
    %c0_5 = arith.constant 0 : index
    %4 = vector.load %arg2[%c0_4, %c0_5] : memref<4x512xf32, #tpu.memory_space<vmem>>, vector<4x512xf32>
    %5 = arith.mulf %3, %4 : vector<4x512xf32>
    %c0_6 = arith.constant 0 : index
    %c0_7 = arith.constant 0 : index
    %6 = vector.load %arg4[%c0_6, %c0_7] : memref<512x256xf32, #tpu.memory_space<vmem>>, vector<512x256xf32>
    %cst_8 = arith.constant dense<0.000000e+00> : vector<4x256xf32>
    %7 = tpu.matmul %5, %6, %cst_8 {dimension_numbers = #tpu.dot_dimension_numbers<[1], [0], [0], [1], [0, 0, 1, 1], [], []>} : vector<4x512xf32>, vector<512x256xf32>, vector<4x256xf32> -> vector<4x256xf32>
    %c0_9 = arith.constant 0 : index
    %c0_10 = arith.constant 0 : index
    %c0_11 = arith.constant 0 : index
    %8 = vector.load %arg5[%c0_9, %c0_10, %c0_11] : memref<1x4x256xf32, #tpu.memory_space<vmem>>, vector<1x4x256xf32>
    %9 = vector.shape_cast %8 : vector<1x4x256xf32> to vector<4x256xf32>
    %10 = vector.shape_cast %7 : vector<4x256xf32> to vector<1x4x256xf32>
    tpu.vector_store %arg5[%c0_9, %c0_10, %c0_11], %10 {strides = array<i32>} : memref<1x4x256xf32, #tpu.memory_space<vmem>>, vector<1x4x256xf32>,
    return
  }
  func.func @transform_0(%arg0: i32) -> (i32, i32, i32) {
    %c0_i32 = arith.constant 0 : i32
    %c0_i32_0 = arith.constant 0 : i32
    %c0_i32_1 = arith.constant 0 : i32
    return %arg0, %c0_i32, %c0_i32_0 : i32, i32, i32
  }
  func.func @transform_1(%arg0: i32) -> (i32, i32) {
    %c0_i32 = arith.constant 0 : i32
    %c0_i32_0 = arith.constant 0 : i32
    %c0_i32_1 = arith.constant 0 : i32
    return %c0_i32, %c0_i32_0 : i32, i32
  }
  func.func @transform_2(%arg0: i32) -> (i32, i32) {
    %c0_i32 = arith.constant 0 : i32
    %c0_i32_0 = arith.constant 0 : i32
    %c0_i32_1 = arith.constant 0 : i32
    return %c0_i32, %c0_i32_0 : i32, i32
  }
  func.func @transform_3(%arg0: i32) -> (i32, i32) {
    %c0_i32 = arith.constant 0 : i32
    %c0_i32_0 = arith.constant 0 : i32
    %c0_i32_1 = arith.constant 0 : i32
    return %c0_i32, %c0_i32_0 : i32, i32
  }
  func.func @transform_4(%arg0: i32) -> (i32, i32, i32) {
    %c0_i32 = arith.constant 0 : i32
    %c0_i32_0 = arith.constant 0 : i32
    %c0_i32_1 = arith.constant 0 : i32
    return %arg0, %c0_i32, %c0_i32_0 : i32, i32, i32
  }
}

</mosaic_0001>

<bundles_post_ra>
// kernel: tpu_custom_call.1
= control target key start
LH: loop header
LB: loop body
LE: loop exit
PB: predicated region body
PF: predicated region fallthrough
CT: control target
= control target key end

     0   :  { %9 = vsyncpa [#allocation3], 0  ;;  %s1783_s0 = inlined_call_operand.hbm [shape: f32[2,4,256], index: 0, kind: input, shape index: {}]   ;;  %s1784_s1 = inlined_call_operand.hbm [shape: f32[4,512], index: 1, kind: input, shape index: {}]   ;;  %s1785_s2 = inlined_call_operand.hbm [shape: f32[256,512], index: 2, kind: input, shape index: {}]   ;;  %s1786_s3 = inlined_call_operand.hbm [shape: f32[512,256], index: 3, kind: input, shape index: {}]   ;;  %s1787_s4 = inlined_call_operand.hbm [shape: f32[2,4,256], index: 4, kind: output, shape index: {}]  }
   0x1   :  { %11 = vsyncpa [#allocation3 + $0x1], 0 }
   0x2   :  { %12 = vsyncpa [#allocation6], 0 }
   0x3   :  { %13 = vsyncpa [#allocation9], 0 }
   0x4   :  { %14 = vsyncpa [#allocation4], 0 }
   0x5   :  { %16 = vsyncpa [#allocation4 + $0x1], 0  ;;  %s1519_s15 = smov 0   ;;  %s1521_s16 = smov 0  }
   0x6   :  { %s1523_s17 = smov 0   ;;  %s1525_s18 = smov 0  }
   0x7 LB: > { %s1540_s19 = sadd.s32 4294967295, %s1483_s18   ;;  %s931_s20 = sadd.s32 4294967294, %s1483_s18   ;;  %s1483_s18 = sphi %s1525_s18, %s1810_s18   ;;  %s1479_s17 = sphi %s1523_s17, %s1809_s17   ;;  %s1475_s16 = sphi %s1521_s16, %s1808_s16   ;;  %s1471_s15 = sphi %s1519_s15, %s1807_s15  }
   0x8   : > { %p42_p0 = scmp.ne.s32.totalorder %s1475_s16, %s1471_s15  ;;  %p1788_p1 = scmp.eq.s32.totalorder %s1540_s19, 0 }
   0x9   : > { %p135_p3 = scmp.eq.s32.totalorder %s931_s20, 1  ;;  %p932_p5 = scmp.ge.s32.totalorder %s1483_s18, 1 }
   0xa   : > { %p1549_p4 = por %p1788_p1, %p42_p0  ;;  %p142_p7 = scmp.lt.s32.totalorder %s1483_s18, 3 }
   0xb   : > { %p1554_p6 = por %p135_p3, %p42_p0  ;;  %s1485_s24 = smov [#allocation5]  }
   0xc   : > { %s1791_s21 = scalar_select %p1549_p4, 1, 0 }
   0xd   : > { %s1792_s22 = scalar_select %p1554_p6, 1, 0 }
   0xe   : > { %p1559_p8 = pnand %p932_p5, %p142_p7  ;;  %s155_s25 = sshll.u32 %s1485_s24, 4  ;;  %s156_s25 = int_to_ptr.vmem [resolvable:$true] %s155_s25 }
   0xf   : > { %s1486_s26 = smov [#allocation7]   ;;  %s1487_s29 = smov [#allocation8]  }
  0x10   : > { %s1793_s23 = scalar_select %p1559_p8, 1, 0 }
  0x11   : > { %p1227_p10 = pneg %p1559_p8  ;;  %s165_s27 = sshll.u32 %s1486_s26, 4  ;;  %s1572_s27 = int_to_ptr.vmem [resolvable:$true] %s165_s27 }
  0x12   : > { %s1574_s30 = sshll.u32 %s1487_s29, 4  ;;  %s1295_s7 = scalar_lea.hbm %s1784_s1, 256  ;;  %s179_s30 = int_to_ptr.vmem [resolvable:$true] %s1574_s30 }
  0x13   : > { %p1568_p11 = pnand %p1227_p10, %p1788_p1  ;;  %p1296_p12 = scmp.ne.s32.totalorder %s1784_s1, %s1295_s7 }
  0x14   : > { %p1302_p5 = scmp.lt.u32.totalorder %s1295_s7, %s1784_s1 }
  0x15   : > { %p1584_p13 = pneg %p1568_p11 }
  0x17   : > { %p1298_p0 = pnand %p1584_p13, %p1296_p12 }
  0x19   : > { %p1299_p3 = pneg %p1298_p0 }
  0x1b   : > { %p1304_p7 = pnand %p1302_p5, %p1299_p3 }
  0x1d   : > { %1307 = shalt.err (!%p1304_p7)
}
  0x1e   : > { %s1308_s13 = scalar_lea.vmem %s156_s25, 256  ;;  %p1316_p2 = scmp.lt.s32.totalorder %s156_s25, %s156_s25 }
  0x1f   : > { %p1309_p10 = scmp.ne.s32.totalorder %s156_s25, %s1308_s13  ;;  %p1317_p6 = scmp.lt.s32.totalorder %s1308_s13, %s1308_s13 }
  0x21   : > { %p1311_p9 = pnand %p1309_p10, %p1584_p13  ;;  %p1318_p4 = por %p1317_p6, %p1316_p2 }
  0x23   : > { %p1312_p1 = pneg %p1311_p9 }
  0x25   : > { %p1319_p8 = pnand %p1318_p4, %p1312_p1 }
  0x27   : > { %1322 = shalt.err (!%p1319_p8)
}
  0x28   : > { %1230 = dma.hbm_to_vmem [thread:$0]  (!%p1568_p11), %s1784_s1, 256, %s156_s25, [#allocation6]  }
  0x29   : > { %s1323_s29 = scalar_lea.hbm %s1785_s2, 16384 }
  0x2a   : > { %p1324_p9 = scmp.ne.s32.totalorder %s1785_s2, %s1323_s29  ;;  %p1330_p1 = scmp.lt.u32.totalorder %s1323_s29, %s1785_s2 }
  0x2c   : > { %p1326_p12 = pnand %p1324_p9, %p1584_p13 }
  0x2e   : > { %p1327_p2 = pneg %p1326_p12 }
  0x30   : > { %p1332_p4 = pnand %p1330_p1, %p1327_p2 }
  0x32   : > { %1335 = shalt.err (!%p1332_p4)
}
  0x33   : > { %s1336_s25 = scalar_lea.vmem %s1572_s27, 16384  ;;  %p1344_p3 = scmp.lt.s32.totalorder %s1572_s27, %s1572_s27 }
  0x34   : > { %p1337_p6 = scmp.ne.s32.totalorder %s1572_s27, %s1336_s25  ;;  %p1345_p5 = scmp.lt.s32.totalorder %s1336_s25, %s1336_s25 }
  0x36   : > { %p1339_p8 = pnand %p1337_p6, %p1584_p13  ;;  %p1346_p7 = por %p1345_p5, %p1344_p3 }
  0x38   : > { %p1340_p0 = pneg %p1339_p8 }
  0x3a   : > { %p1347_p10 = pnand %p1346_p7, %p1340_p0 }
  0x3c   : > { %1350 = shalt.err (!%p1347_p10)
}
  0x3d   : > { %s1488_s9 = smov 512   ;;  %s1489_s11 = smov 32  }
  0x3e   : > { %1233 = dma.hbm_to_vmem [thread:$0]  (!%p1568_p11), %s1785_s2, 16384, %s1572_s27, [#allocation6], %s1488_s9, %s1488_s9, %s1489_s11  }
  0x3f   : > { %s1351_s24 = scalar_lea.hbm %s1786_s3, 16384 }
  0x40   : > { %p1352_p9 = scmp.ne.s32.totalorder %s1786_s3, %s1351_s24  ;;  %p1358_p1 = scmp.lt.u32.totalorder %s1351_s24, %s1786_s3 }
  0x42   : > { %p1354_p12 = pnand %p1352_p9, %p1584_p13 }
  0x44   : > { %p1355_p2 = pneg %p1354_p12 }
  0x46   : > { %p1360_p4 = pnand %p1358_p1, %p1355_p2 }
  0x48   : > { %1363 = shalt.err (!%p1360_p4)
}
  0x49   : > { %s1364_s7 = scalar_lea.vmem %s179_s30, 16384  ;;  %p1372_p3 = scmp.lt.s32.totalorder %s179_s30, %s179_s30 }
  0x4a   : > { %p1365_p6 = scmp.ne.s32.totalorder %s179_s30, %s1364_s7  ;;  %p1373_p5 = scmp.lt.s32.totalorder %s1364_s7, %s1364_s7 }
  0x4c   : > { %p1367_p8 = pnand %p1365_p6, %p1584_p13  ;;  %p1374_p7 = por %p1373_p5, %p1372_p3 }
  0x4e   : > { %p1368_p0 = pneg %p1367_p8 }
  0x50   : > { %p1375_p10 = pnand %p1374_p7, %p1368_p0 }
  0x52   : > { %1378 = shalt.err (!%p1375_p10)
}
  0x53   : > { %s1490_s27 = smov 256   ;;  %s1491_s10 = smov 16  }
  0x54   : > { %1236 = dma.hbm_to_vmem [thread:$0]  (!%p1568_p11), %s1786_s3, 16384, %s179_s30, [#allocation9], %s1490_s27, %s1490_s27, %s1491_s10  }
  0x55   : > { %s1643_s9 = sadd.s32 1, %s1483_s18   ;;  %s29_s12 = sadd.s32 1, %s1479_s17 }
  0x56   : > { %s26_s11 = ssub.s32 %s1483_s18, %s1643_s9  ;;  %p36_p9 = scmp.ne.s32.totalorder %s1479_s17, %s1475_s16 }
  0x57   : > { %p27_p13 = scmp.eq.s32.totalorder %s26_s11, 0  ;;  %p37_p12 = scmp.eq.s32.totalorder %s1483_s18, 0 }
  0x58   : > { %p1248_p2 = scmp.lt.s32.totalorder %s1483_s18, 2  ;;  %p1796_p4 = scmp.eq.s32.totalorder %s1540_s19, 1 }
  0x59   : > { %s1653_s13 = scalar_select %p27_p13, %s1479_s17, %s29_s12  }
  0x5a   : > { %p38_p1 = por %p37_p12, %p36_p9  ;;  %p1657_p6 = por %p1796_p4, %p36_p9 }
  0x5b   : > { %s192_s28 = sand.u32 1, %s1479_s17   ;;  %s951_s20 = sshll.u32 %s1483_s18, 7 }
  0x5c   : > { %s937_s30 = sshll.u32 %s192_s28, 3  ;;  %s1666_s29 = scalar_lea.hbm %s1783_s0, %s951_s20 }
  0x5d   : > { %s196_s5 = scalar_lea.vmem [#allocation2], %s937_s30  ;;  %p1668_p11 = pnand %p1248_p2, %p38_p1 }
  0x5e   : > { %s204_s6 = sshll.u32 %s196_s5, 4  ;;  %s193_s27 = scalar_lea.sflag [#allocation3], %s192_s28  ;;  %s1672_s6 = int_to_ptr.vmem [resolvable:$true] %s204_s6 }
  0x5f   : > { %s1379_s10 = scalar_lea.hbm %s1666_s29, 128  ;;  %p1381_p0 = pneg %p1668_p11 }
  0x60   : > { %p1380_p8 = scmp.ne.s32.totalorder %s1666_s29, %s1379_s10  ;;  %s1384_s11 = scalar_lea.hbm %s1783_s0, 256 }
  0x61   : > { %p1385_p7 = scmp.lt.u32.totalorder %s1666_s29, %s1783_s0  ;;  %p1386_p10 = scmp.lt.u32.totalorder %s1384_s11, %s1379_s10 }
  0x62   : > { %p1382_p3 = pnand %p1381_p0, %p1380_p8  ;;  %p1388_p9 = scmp.lt.u32.totalorder %s1379_s10, %s1666_s29 }
  0x63   : > { %p1387_p13 = por %p1386_p10, %p1385_p7 }
  0x64   : > { %p1383_p5 = pneg %p1382_p3 }
  0x65   : > { %p1389_p12 = por %p1388_p9, %p1387_p13 }
  0x67   : > { %p1390_p2 = pnand %p1389_p12, %p1383_p5 }
  0x69   : > { %1393 = shalt.err (!%p1390_p2)
}
  0x6a   : > { %s1394_s28 = scalar_lea.vmem %s1672_s6, 128  ;;  %s1492_s30 = smov [#allocation2]  }
  0x6b   : > { %p1395_p1 = scmp.ne.s32.totalorder %s1672_s6, %s1394_s28  ;;  %s1399_s24 = sshll.u32 %s1492_s30, 4  ;;  %s1400_s24 = int_to_ptr.vmem [resolvable:$false] %s1399_s24 }
  0x6c   : > { %s1401_s26 = scalar_lea.vmem %s1400_s24, 256  ;;  %p1402_p3 = scmp.lt.s32.totalorder %s1672_s6, %s1400_s24 }
  0x6d   : > { %p1397_p4 = pnand %p1395_p1, %p1381_p0  ;;  %p1403_p7 = scmp.lt.s32.totalorder %s1401_s26, %s1394_s28 }
  0x6f   : > { %p1398_p8 = pneg %p1397_p4  ;;  %p1404_p10 = por %p1403_p7, %p1402_p3 }
  0x71   : > { %p1405_p13 = pnand %p1404_p10, %p1398_p8 }
  0x73   : > { %1408 = shalt.err (!%p1405_p13)
}
  0x74   : > { %1240 = dma.hbm_to_vmem [thread:$0]  (!%p1668_p11), %s1666_s29, 128, %s1672_s6, %s193_s27  }
  0x75   : > { %p1799_p5 = scmp.ne.s32.totalorder %s1793_s23, 0 }
  0x76   : > { %s1702_s5 = sand.u32 (!%p1799_p5), 1, %s1475_s16   ;;  %p1800_p0 = scmp.ne.s32.totalorder (!%p1799_p5), %s1791_s21, 0 }
  0x77   : > { %213 = sbr.rel (%p1799_p5) target bundleno = 711 (0x2c7), region = 36  ;;  %s941_s10 = sshll.u32 (!%p1799_p5), %s1702_s5, 3 }
  0x78   : > { %s216_s8 = scalar_lea.sflag (!%p1799_p5), [#allocation3], %s1702_s5  ;;  %s1708_s25 = scalar_lea.vmem (!%p1799_p5), [#allocation2], %s941_s10 }
  0x7e   : > { %1454 = dma.done.wait (%p1800_p0), %s216_s8, 128  }
  0x7f   : > { %1456 = vsyncadd (%p1800_p0), %s216_s8, 4294967168  ;;  %p1801_p11 = scmp.eq.s32.totalorder %s1540_s19, 0 }
  0x81   : > { %1458 = dma.done.wait (%p1801_p11), [#allocation6], 16640   ;;  %p1802_p9 = pmov %p1801_p11 }
  0x83   : > { %1460 = vsyncadd (%p1802_p9), [#allocation6], 4294950656  ;;  %p1803_p12 = pmov %p1802_p9 }
  0x84   : > { %p1804_p2 = pmov %p1802_p9 }
  0x85   : > { %1462 = dma.done.wait (%p1803_p12), [#allocation9], 16384  }
  0x86   : > { %1464 = vsyncadd (%p1804_p2), [#allocation9], 4294950912  ;;  %v258_v0 = vld [vmem:[#allocation7 + $0x8] sm:$0xff]  ;;  %v257_v2 = vld [vmem:[#allocation7] sm:$0xff]  ;;  %s952_s21 = sshll.u32 %s1540_s19, 7  ;;  %s255_s23 = scalar_lea.vmem [#allocation10], %s941_s10 }
  0x87   : > { %v262_v1 = vld [vmem:[#allocation7 + $0x28] sm:$0xff]  ;;  %v261_v4 = vld [vmem:[#allocation7 + $0x20] sm:$0xff]  ;;  %s832_s29 = sshll.u32 %s255_s23, 4  ;;  %s1739_s27 = scalar_lea.hbm %s1787_s4, %s952_s21  ;;  %s1741_s29 = int_to_ptr.vmem [resolvable:$true] %s832_s29 }
  0x88   : > { %v953_v3 = vpack.c.bf16 %v262_v1, %v258_v0  ;;  %v266_v5 = vld [vmem:[#allocation7 + $0x48] sm:$0xff]  ;;  %v955_v7 = vpack.c.bf16 %v261_v4, %v257_v2  ;;  %v265_v9 = vld [vmem:[#allocation7 + $0x40] sm:$0xff]  ;;  %s818_s11 = scalar_lea.sflag [#allocation4], %s1702_s5  ;;  %s1409_s12 = scalar_lea.vmem %s1741_s29, 128 }
  0x89   : > { %v270_v6 = vld [vmem:[#allocation7 + $0x68] sm:$0xff]  ;;  %v269_v10 = vld [vmem:[#allocation7 + $0x60] sm:$0xff]  ;;  %p1410_p1 = scmp.ne.s32.totalorder %s1741_s29, %s1409_s12  ;;  %s1493_s19 = smov [#allocation10]  }
  0x8a   : > { %v957_v8 = vpack.c.bf16 %v270_v6, %v266_v5  ;;  %v274_v11 = vld [vmem:[#allocation7 + $0x88] sm:$0xff]  ;;  %954 = vmatprep.subr.bf16.mxu1 %v953_v3  ;;  %v959_v13 = vpack.c.bf16 %v269_v10, %v265_v9  ;;  %v273_v15 = vld [vmem:[#allocation7 + $0x80] sm:$0xff]  ;;  %s1413_s20 = sshll.u32 %s1493_s19, 4  ;;  %s1414_s20 = int_to_ptr.vmem [resolvable:$false] %s1413_s20 }
  0x8b   : > { %v278_v12 = vld [vmem:[#allocation7 + $0xa8] sm:$0xff]  ;;  %956 = vmatpush1.bf16.msra.mxu1 %v955_v7  ;;  %v277_v16 = vld [vmem:[#allocation7 + $0xa0] sm:$0xff]  ;;  %p1411_p4 = pnand %p1410_p1, %p1657_p6  ;;  %s1415_s28 = scalar_lea.vmem %s1414_s20, 256 }
  0x8c   : > { %958 = vmatprep.subr.bf16.mxu1 %v957_v8  ;;  %v961_v14 = vpack.c.bf16 %v278_v12, %v274_v11  ;;  %v282_v17 = vld [vmem:[#allocation7 + $0xc8] sm:$0xff]  ;;  %v963_v19 = vpack.c.bf16 %v277_v16, %v273_v15  ;;  %v281_v21 = vld [vmem:[#allocation7 + $0xc0] sm:$0xff]  ;;  %p1416_p3 = scmp.lt.s32.totalorder %s1741_s29, %s1414_s20  ;;  %p1417_p7 = scmp.lt.s32.totalorder %s1415_s28, %s1409_s12 }
  0x8d   : > { %v286_v18 = vld [vmem:[#allocation7 + $0xe8] sm:$0xff]  ;;  %v285_v22 = vld [vmem:[#allocation7 + $0xe0] sm:$0xff]  ;;  %p1412_p8 = pneg %p1411_p4 }
  0x8e   : > { %v965_v20 = vpack.c.bf16 %v286_v18, %v282_v17  ;;  %v290_v23 = vld [vmem:[#allocation7 + $0x108] sm:$0xff]  ;;  %v967_v25 = vpack.c.bf16 %v285_v22, %v281_v21  ;;  %v289_v27 = vld [vmem:[#allocation7 + $0x100] sm:$0xff]  ;;  %v544_v18 = vld [vmem:[#allocation8 + $0x10] sm:$0xff]  ;;  %p1418_p10 = por %p1417_p7, %p1416_p3 }
  0x8f   : > { %960 = vmatpush1.bf16.msra.mxu1 %v959_v13  ;;  %v294_v24 = vld [vmem:[#allocation7 + $0x128] sm:$0xff]  ;;  %v293_v28 = vld [vmem:[#allocation7 + $0x120] sm:$0xff] }
  0x90   : > { %962 = vmatprep.subr.bf16.mxu1 %v961_v14  ;;  %v969_v26 = vpack.c.bf16 %v294_v24, %v290_v23  ;;  %v298_v29 = vld [vmem:[#allocation7 + $0x148] sm:$0xff]  ;;  %v971_v31 = vpack.c.bf16 %v293_v28, %v289_v27  ;;  %v297_v33 = vld [vmem:[#allocation7 + $0x140] sm:$0xff]  ;;  %v545_v14 = vld [vmem:[#allocation8 + $0x18] sm:$0xff]  ;;  %p1419_p13 = pnand %p1418_p10, %p1412_p8 }
  0x91   : > { %v302_v30 = vld [vmem:[#allocation7 + $0x168] sm:$0xff]  ;;  %v301_v34 = vld [vmem:[#allocation7 + $0x160] sm:$0xff] }
  0x92   : > { %v973_v32 = vpack.c.bf16 %v302_v30, %v298_v29  ;;  %v306_v35 = vld [vmem:[#allocation7 + $0x188] sm:$0xff]  ;;  %v975_v37 = vpack.c.bf16 %v301_v34, %v297_v33  ;;  %v305_v39 = vld [vmem:[#allocation7 + $0x180] sm:$0xff]  ;;  %v553_v29 = vld [vmem:[#allocation8 + $0x58] sm:$0xff] }
  0x93   : > { %964 = vmatpush1.bf16.msra.mxu1 %v963_v19  ;;  %v310_v36 = vld [vmem:[#allocation7 + $0x1a8] sm:$0xff]  ;;  %v309_v40 = vld [vmem:[#allocation7 + $0x1a0] sm:$0xff] }
  0x94   : > { %966 = vmatprep.subr.bf16.mxu1 %v965_v20  ;;  %v977_v38 = vpack.c.bf16 %v310_v36, %v306_v35  ;;  %v1723_v41 = vld [vmem:[%s1708_s25] sm:$0xff]  ;;  %v979_v45 = vpack.c.bf16 %v309_v40, %v305_v39  ;;  %v549_v20 = vld [vmem:[#allocation8 + $0x38] sm:$0xff]  ;;  %v552_v35 = vld [vmem:[#allocation8 + $0x50] sm:$0xff] }
  0x95   : > { %v314_v42 = vld [vmem:[#allocation7 + $0x1c8] sm:$0xff]  ;;  %v1727_v44 = vcombine.high %v1723_v41, %v1723_v41  ;;  %v313_v47 = vld [vmem:[#allocation7 + $0x1c0] sm:$0xff]  ;;  %v557_v39 = vld [vmem:[#allocation8 + $0x78] sm:$0xff] }
  0x96   : > { %v318_v43 = vld [vmem:[#allocation7 + $0x1e8] sm:$0xff]  ;;  %v317_v48 = vld [vmem:[#allocation7 + $0x1e0] sm:$0xff] }
  0x97   : > { %968 = vmatpush1.bf16.msra.mxu1 %v967_v25  ;;  %452 = vmatprep.mubr.f32.mxu1 %v1727_v44  ;;  %v981_v46 = vpack.c.bf16 %v318_v43, %v314_v42  ;;  %v322_v49 = vld [vmem:[#allocation7 + $0x208] sm:$0xff]  ;;  %v983_v51 = vpack.c.bf16 %v317_v48, %v313_v47  ;;  %v321_v53 = vld [vmem:[#allocation7 + $0x200] sm:$0xff]  ;;  %v548_v25 = vld [vmem:[#allocation8 + $0x30] sm:$0xff] }
  0x98   : > { %970 = vmatprep.subr.bf16.mxu1 %v969_v26  ;;  %v326_v50 = vld [vmem:[#allocation7 + $0x228] sm:$0xff]  ;;  %v325_v54 = vld [vmem:[#allocation7 + $0x220] sm:$0xff] }
  0x99   : > { %v985_v52 = vpack.c.bf16 %v326_v50, %v322_v49  ;;  %v330_v55 = vld [vmem:[#allocation7 + $0x248] sm:$0xff]  ;;  %v987_v57 = vpack.c.bf16 %v325_v54, %v321_v53  ;;  %v329_v59 = vld [vmem:[#allocation7 + $0x240] sm:$0xff]  ;;  %v556_v49 = vld [vmem:[#allocation8 + $0x70] sm:$0xff] }
  0x9a   : > { %v334_v56 = vld [vmem:[#allocation7 + $0x268] sm:$0xff]  ;;  %v333_v60 = vld [vmem:[#allocation7 + $0x260] sm:$0xff]  ;;  %v561_v53 = vld [vmem:[#allocation8 + $0x98] sm:$0xff] }
  0x9b   : > { %972 = vmatpush1.bf16.msra.mxu1 %v971_v31  ;;  %v989_v58 = vpack.c.bf16 %v334_v56, %v330_v55  ;;  %v338_v61 = vld [vmem:[#allocation7 + $0x288] sm:$0xff]  ;;  %v991_v63 = vpack.c.bf16 %v333_v60, %v329_v59  ;;  %v337_v1 = vld [vmem:[#allocation7 + $0x280] sm:$0xff] }
  0x9c   : > { %974 = vmatprep.subr.bf16.mxu1 %v973_v32  ;;  %v342_v62 = vld [vmem:[#allocation7 + $0x2a8] sm:$0xff]  ;;  %v341_v2 = vld [vmem:[#allocation7 + $0x2a0] sm:$0xff] }
  0x9d   : > { %v993_v0 = vpack.c.bf16 %v342_v62, %v338_v61  ;;  %v346_v3 = vld [vmem:[#allocation7 + $0x2c8] sm:$0xff]  ;;  %v995_v5 = vpack.c.bf16 %v341_v2, %v337_v1  ;;  %v345_v7 = vld [vmem:[#allocation7 + $0x2c0] sm:$0xff]  ;;  %v560_v61 = vld [vmem:[#allocation8 + $0x90] sm:$0xff] }
  0x9e   : > { %v350_v4 = vld [vmem:[#allocation7 + $0x2e8] sm:$0xff]  ;;  %v349_v8 = vld [vmem:[#allocation7 + $0x2e0] sm:$0xff]  ;;  %v565_v1 = vld [vmem:[#allocation8 + $0xb8] sm:$0xff] }
  0x9f   : > { %976 = vmatpush1.bf16.msra.mxu1 %v975_v37  ;;  %v997_v6 = vpack.c.bf16 %v350_v4, %v346_v3  ;;  %v354_v9 = vld [vmem:[#allocation7 + $0x308] sm:$0xff]  ;;  %v353_v11 = vld [vmem:[#allocation7 + $0x300] sm:$0xff]  ;;  %v999_v16 = vpack.c.bf16 %v349_v8, %v345_v7  ;;  %v260_v2 = vld [vmem:[#allocation7 + $0x18] sm:$0xff] }
  0xa0   : > { %978 = vmatprep.subr.bf16.mxu1 %v977_v38  ;;  %v358_v10 = vld [vmem:[#allocation7 + $0x328] sm:$0xff]  ;;  %v357_v12 = vld [vmem:[#allocation7 + $0x320] sm:$0xff]  ;;  %v264_v3 = vld [vmem:[#allocation7 + $0x38] sm:$0xff] }
  0xa1   : > { %v543_v13 = vld [vmem:[#allocation8 + $0x8] sm:$0xff]  ;;  %v542_v15 = vld [vmem:[#allocation8] sm:$0xff]  ;;  %v1001_v21 = vpack.c.bf16 %v358_v10, %v354_v9  ;;  %v1003_v31 = vpack.c.bf16 %v357_v12, %v353_v11  ;;  %v564_v8 = vld [vmem:[#allocation8 + $0xb0] sm:$0xff]  ;;  %v1017_v9 = vpack.c.bf16 %v264_v3, %v260_v2 }
  0xa2   : > { %v1081_v17 = vpack.c.bf16 %v545_v14, %v543_v13  ;;  %v547_v19 = vld [vmem:[#allocation8 + $0x28] sm:$0xff]  ;;  %v1083_v22 = vpack.c.bf16 %v544_v18, %v542_v15  ;;  %v546_v24 = vld [vmem:[#allocation8 + $0x20] sm:$0xff]  ;;  %v259_v10 = vld [vmem:[#allocation7 + $0x10] sm:$0xff] }
  0xa3   : > { %980 = vmatpush1.bf16.msra.mxu1 %v979_v45  ;;  %v1085_v23 = vpack.c.bf16 %v549_v20, %v547_v19  ;;  %v551_v26 = vld [vmem:[#allocation8 + $0x48] sm:$0xff]  ;;  %v1087_v30 = vpack.c.bf16 %v548_v25, %v546_v24  ;;  %v361_v32 = vld [vmem:[#allocation7 + $0x340] sm:$0xff]  ;;  %v263_v11 = vld [vmem:[#allocation7 + $0x30] sm:$0xff] }
  0xa4   : > { %982 = vmatprep.subr.bf16.mxu1 %v981_v46  ;;  %v362_v27 = vld [vmem:[#allocation7 + $0x348] sm:$0xff]  ;;  %1082 = vmatprep.subr.bf16.mxu0 %v1081_v17  ;;  %v1089_v33 = vpack.c.bf16 %v553_v29, %v551_v26  ;;  %v550_v34 = vld [vmem:[#allocation8 + $0x40] sm:$0xff]  ;;  %v268_v12 = vld [vmem:[#allocation7 + $0x58] sm:$0xff]  ;;  %v1019_v17 = vpack.c.bf16 %v263_v11, %v259_v10 }
  0xa5   : > { %v366_v28 = vld [vmem:[#allocation7 + $0x368] sm:$0xff]  ;;  %1084 = vmatpush1.bf16.msra.mxu0 %v1083_v22  ;;  %v365_v37 = vld [vmem:[#allocation7 + $0x360] sm:$0xff]  ;;  %v1091_v43 = vpack.c.bf16 %v552_v35, %v550_v34  ;;  %v272_v13 = vld [vmem:[#allocation7 + $0x78] sm:$0xff] }
  0xa6   : > { %1086 = vmatprep.subr.bf16.mxu0 %v1085_v23  ;;  %v1005_v36 = vpack.c.bf16 %v366_v28, %v362_v27  ;;  %v555_v38 = vld [vmem:[#allocation8 + $0x68] sm:$0xff]  ;;  %v1007_v45 = vpack.c.bf16 %v365_v37, %v361_v32  ;;  %v369_v46 = vld [vmem:[#allocation7 + $0x380] sm:$0xff]  ;;  %v569_v15 = vld [vmem:[#allocation8 + $0xd8] sm:$0xff] }
  0xa7   : > { %984 = vmatpush1.bf16.msra.mxu1 %v983_v51  ;;  %v370_v40 = vld [vmem:[#allocation7 + $0x388] sm:$0xff]  ;;  %v1093_v47 = vpack.c.bf16 %v557_v39, %v555_v38  ;;  %v554_v48 = vld [vmem:[#allocation8 + $0x60] sm:$0xff]  ;;  %v267_v18 = vld [vmem:[#allocation7 + $0x50] sm:$0xff] }
  0xa8   : > { %986 = vmatprep.subr.bf16.mxu1 %v985_v52  ;;  %v374_v42 = vld [vmem:[#allocation7 + $0x3a8] sm:$0xff]  ;;  %v373_v51 = vld [vmem:[#allocation7 + $0x3a0] sm:$0xff]  ;;  %v1095_v56 = vpack.c.bf16 %v556_v49, %v554_v48  ;;  %v568_v20 = vld [vmem:[#allocation8 + $0xd0] sm:$0xff] }
  0xa9   : > { %1088 = vmatpush1.bf16.msra.mxu0 %v1087_v30  ;;  %v1009_v50 = vpack.c.bf16 %v374_v42, %v370_v40  ;;  %v559_v52 = vld [vmem:[#allocation8 + $0x88] sm:$0xff]  ;;  %v558_v60 = vld [vmem:[#allocation8 + $0x80] sm:$0xff]  ;;  %v271_v22 = vld [vmem:[#allocation7 + $0x70] sm:$0xff] }
  0xaa   : > { %1090 = vmatprep.subr.bf16.mxu0 %v1089_v33  ;;  %v378_v54 = vld [vmem:[#allocation7 + $0x3c8] sm:$0xff]  ;;  %v1097_v59 = vpack.c.bf16 %v561_v53, %v559_v52  ;;  %v1099_v4 = vpack.c.bf16 %v560_v61, %v558_v60  ;;  %v562_v7 = vld [vmem:[#allocation8 + $0xa0] sm:$0xff]  ;;  %v573_v25 = vld [vmem:[#allocation8 + $0xf8] sm:$0xff]  ;;  %v1023_v29 = vpack.c.bf16 %v271_v22, %v267_v18 }
  0xab   : > { %988 = vmatpush1.bf16.msra.mxu1 %v987_v57  ;;  %v382_v55 = vld [vmem:[#allocation7 + $0x3e8] sm:$0xff]  ;;  %v1011_v57 = vpack.c.bf16 %v373_v51, %v369_v46  ;;  %v566_v19 = vld [vmem:[#allocation8 + $0xc0] sm:$0xff]  ;;  %v276_v26 = vld [vmem:[#allocation7 + $0x98] sm:$0xff] }
  0xac   : > { %990 = vmatprep.subr.bf16.mxu1 %v989_v58  ;;  %v377_v58 = vld [vmem:[#allocation7 + $0x3c0] sm:$0xff]  ;;  %v1013_v62 = vpack.c.bf16 %v382_v55, %v378_v54  ;;  %v567_v14 = vld [vmem:[#allocation8 + $0xc8] sm:$0xff]  ;;  %v280_v27 = vld [vmem:[#allocation7 + $0xb8] sm:$0xff]  ;;  %v1107_v28 = vpack.c.bf16 %v568_v20, %v566_v19 }
  0xad   : > { %1092 = vmatpush1.bf16.msra.mxu0 %v1091_v43  ;;  %v1105_v23 = vpack.c.bf16 %v569_v15, %v567_v14  ;;  %v571_v24 = vld [vmem:[#allocation8 + $0xe8] sm:$0xff]  ;;  %v275_v30 = vld [vmem:[#allocation7 + $0x90] sm:$0xff]  ;;  %v570_v32 = vld [vmem:[#allocation8 + $0xe0] sm:$0xff]  ;;  %v1025_v34 = vpack.c.bf16 %v280_v27, %v276_v26 }
  0xae   : > { %1094 = vmatprep.subr.bf16.mxu0 %v1093_v47  ;;  %v572_v33 = vld [vmem:[#allocation8 + $0xf0] sm:$0xff]  ;;  %v577_v37 = vld [vmem:[#allocation8 + $0x118] sm:$0xff]  ;;  %v574_v46 = vld [vmem:[#allocation8 + $0x100] sm:$0xff] }
  0xaf   : > { %992 = vmatpush1.bf16.msra.mxu1 %v991_v63  ;;  %v381_v63 = vld [vmem:[#allocation7 + $0x3e0] sm:$0xff]  ;;  %v279_v35 = vld [vmem:[#allocation7 + $0xb0] sm:$0xff]  ;;  %v284_v38 = vld [vmem:[#allocation7 + $0xd8] sm:$0xff]  ;;  %v1111_v40 = vpack.c.bf16 %v572_v33, %v570_v32 }
  0xb0   : > { %994 = vmatprep.subr.bf16.mxu1 %v993_v0  ;;  %v563_v0 = vld [vmem:[#allocation8 + $0xa8] sm:$0xff]  ;;  %v288_v39 = vld [vmem:[#allocation7 + $0xf8] sm:$0xff]  ;;  %v1027_v42 = vpack.c.bf16 %v279_v35, %v275_v30  ;;  %v283_v43 = vld [vmem:[#allocation7 + $0xd0] sm:$0xff] }
  0xb1   : > { %1096 = vmatpush1.bf16.msra.mxu0 %v1095_v56  ;;  %v1029_v47 = vpack.c.bf16 %v288_v39, %v284_v38  ;;  %v287_v48 = vld [vmem:[#allocation7 + $0xf0] sm:$0xff]  ;;  %v579_v49 = vld [vmem:[#allocation8 + $0x128] sm:$0xff]  ;;  %v292_v51 = vld [vmem:[#allocation7 + $0x118] sm:$0xff] }
  0xb2   : > { %1098 = vmatprep.subr.bf16.mxu0 %v1097_v59  ;;  %v296_v52 = vld [vmem:[#allocation7 + $0x138] sm:$0xff]  ;;  %v1031_v54 = vpack.c.bf16 %v287_v48, %v283_v43  ;;  %v291_v55 = vld [vmem:[#allocation7 + $0x110] sm:$0xff]  ;;  %v583_v61 = vld [vmem:[#allocation8 + $0x148] sm:$0xff] }
  0xb3   : > { %996 = vmatpush1.bf16.msra.mxu1 %v995_v5  ;;  %v1015_v5 = vpack.c.bf16 %v381_v63, %v377_v58  ;;  %v580_v58 = vld [vmem:[#allocation8 + $0x130] sm:$0xff]  ;;  %v1033_v59 = vpack.c.bf16 %v296_v52, %v292_v51  ;;  %v300_v63 = vld [vmem:[#allocation7 + $0x158] sm:$0xff]  ;;  %v595_v33 = vld [vmem:[#allocation8 + $0x1a8] sm:$0xff] }
  0xb4   : > { %998 = vmatprep.subr.bf16.mxu1 %v997_v6  ;;  %v1101_v6 = vpack.c.bf16 %v565_v1, %v563_v0  ;;  %v295_v60 = vld [vmem:[#allocation7 + $0x130] sm:$0xff]  ;;  %v304_v0 = vld [vmem:[#allocation7 + $0x178] sm:$0xff] }
  0xb5   : > { %1100 = vmatpush1.bf16.msra.mxu0 %v1099_v4  ;;  %v1035_v2 = vpack.c.bf16 %v295_v60, %v291_v55  ;;  %v299_v3 = vld [vmem:[#allocation7 + $0x150] sm:$0xff]  ;;  %v589_v10 = vld [vmem:[#allocation8 + $0x178] sm:$0xff] }
  0xb6   : > { %1102 = vmatprep.subr.bf16.mxu0 %v1101_v6  ;;  %v584_v6 = vld [vmem:[#allocation8 + $0x150] sm:$0xff]  ;;  %v308_v11 = vld [vmem:[#allocation7 + $0x198] sm:$0xff] }
  0xb7   : > { %1000 = vmatpush1.bf16.msra.mxu1 %v999_v16  ;;  %v1103_v16 = vpack.c.bf16 %v564_v8, %v562_v7  ;;  %v1037_v7 = vpack.c.bf16 %v304_v0, %v300_v63  ;;  %v303_v8 = vld [vmem:[#allocation7 + $0x170] sm:$0xff]  ;;  %v593_v22 = vld [vmem:[#allocation8 + $0x198] sm:$0xff] }
  0xb8   : > { %1002 = vmatprep.subr.bf16.mxu1 %v1001_v21  ;;  %v1021_v21 = vpack.c.bf16 %v272_v13, %v268_v12  ;;  %v312_v12 = vld [vmem:[#allocation7 + $0x1b8] sm:$0xff]  ;;  %v1039_v14 = vpack.c.bf16 %v303_v8, %v299_v3  ;;  %v307_v15 = vld [vmem:[#allocation7 + $0x190] sm:$0xff] }
  0xb9   : > { %1104 = vmatpush1.bf16.msra.mxu0 %v1103_v16  ;;  %v588_v18 = vld [vmem:[#allocation8 + $0x170] sm:$0xff]  ;;  %v1041_v19 = vpack.c.bf16 %v312_v12, %v308_v11  ;;  %v324_v35 = vld [vmem:[#allocation7 + $0x218] sm:$0xff] }
  0xba   : > { %1106 = vmatprep.subr.bf16.mxu0 %v1105_v23  ;;  %v311_v20 = vld [vmem:[#allocation7 + $0x1b0] sm:$0xff]  ;;  %v316_v23 = vld [vmem:[#allocation7 + $0x1d8] sm:$0xff] }
  0xbb   : > { %1004 = vmatpush1.bf16.msra.mxu1 %v1003_v31  ;;  %v1109_v31 = vpack.c.bf16 %v573_v25, %v571_v24  ;;  %v320_v24 = vld [vmem:[#allocation7 + $0x1f8] sm:$0xff]  ;;  %v1043_v26 = vpack.c.bf16 %v311_v20, %v307_v15  ;;  %v315_v27 = vld [vmem:[#allocation7 + $0x1d0] sm:$0xff] }
  0xbc   : > { %1006 = vmatprep.subr.bf16.mxu1 %v1005_v36  ;;  %v575_v36 = vld [vmem:[#allocation8 + $0x108] sm:$0xff]  ;;  %v592_v30 = vld [vmem:[#allocation8 + $0x190] sm:$0xff]  ;;  %v332_v48 = vld [vmem:[#allocation7 + $0x258] sm:$0xff] }
  0xbd   : > { %1108 = vmatpush1.bf16.msra.mxu0 %v1107_v28  ;;  %v319_v32 = vld [vmem:[#allocation7 + $0x1f0] sm:$0xff]  ;;  %v360_v8 = vld [vmem:[#allocation7 + $0x338] sm:$0xff] }
  0xbe   : > { %1110 = vmatprep.subr.bf16.mxu0 %v1109_v31  ;;  %v1045_v31 = vpack.c.bf16 %v320_v24, %v316_v23  ;;  %v1047_v38 = vpack.c.bf16 %v319_v32, %v315_v27  ;;  %v323_v39 = vld [vmem:[#allocation7 + $0x210] sm:$0xff]  ;;  %v376_v20 = vld [vmem:[#allocation7 + $0x3b8] sm:$0xff]  ;;  %v603_v32 = vld [vmem:[#allocation8 + $0x1e8] sm:$0xff] }
  0xbf   : > { %1008 = vmatpush1.bf16.msra.mxu1 %v1007_v45  ;;  %v1113_v45 = vpack.c.bf16 %v577_v37, %v575_v36  ;;  %v328_v36 = vld [vmem:[#allocation7 + $0x238] sm:$0xff]  ;;  %v596_v43 = vld [vmem:[#allocation8 + $0x1b0] sm:$0xff] }
  0xc0   : > { %1010 = vmatprep.subr.bf16.mxu1 %v1009_v50  ;;  %v581_v50 = vld [vmem:[#allocation8 + $0x138] sm:$0xff]  ;;  %v339_v63 = vld [vmem:[#allocation7 + $0x290] sm:$0xff] }
  0xc1   : > { %1112 = vmatpush1.bf16.msra.mxu0 %v1111_v40  ;;  %v1117_v56 = vpack.c.bf16 %v581_v50, %v579_v49  ;;  %v336_v49 = vld [vmem:[#allocation7 + $0x278] sm:$0xff]  ;;  %v343_v0 = vld [vmem:[#allocation7 + $0x2b0] sm:$0xff] }
  0xc2   : > { %1114 = vmatprep.subr.bf16.mxu0 %v1113_v45  ;;  %v1049_v45 = vpack.c.bf16 %v328_v36, %v324_v35  ;;  %v1053_v55 = vpack.c.bf16 %v336_v49, %v332_v48  ;;  %v1059_v3 = vpack.c.bf16 %v343_v0, %v339_v63  ;;  %v355_v11 = vld [vmem:[#allocation7 + $0x310] sm:$0xff]  ;;  %v602_v35 = vld [vmem:[#allocation8 + $0x1e0] sm:$0xff]  ;;  %v613_v48 = vld [vmem:[#allocation8 + $0x238] sm:$0xff] }
  0xc3   : > { %1012 = vmatpush1.bf16.msra.mxu1 %v1011_v57  ;;  %v578_v57 = vld [vmem:[#allocation8 + $0x120] sm:$0xff]  ;;  %v359_v12 = vld [vmem:[#allocation7 + $0x330] sm:$0xff] }
  0xc4   : > { %1014 = vmatprep.subr.bf16.mxu1 %v1013_v62  ;;  %v585_v62 = vld [vmem:[#allocation8 + $0x158] sm:$0xff]  ;;  %v1119_v1 = vpack.c.bf16 %v580_v58, %v578_v57  ;;  %v335_v57 = vld [vmem:[#allocation7 + $0x270] sm:$0xff]  ;;  %v1067_v15 = vpack.c.bf16 %v359_v12, %v355_v11 }
  0xc5   : > { %v1121_v4 = vpack.c.bf16 %v585_v62, %v583_v61  ;;  %v340_v58 = vld [vmem:[#allocation7 + $0x298] sm:$0xff]  ;;  %v371_v23 = vld [vmem:[#allocation7 + $0x390] sm:$0xff] }
  0xc6   : > { %v375_v24 = vld [vmem:[#allocation7 + $0x3b0] sm:$0xff] }
  0xc7   : > { %1016 = vmatpush1.bf16.msra.mxu1 %v1015_v5  ;;  %v582_v5 = vld [vmem:[#allocation8 + $0x140] sm:$0xff]  ;;  %v1075_v27 = vpack.c.bf16 %v375_v24, %v371_v23  ;;  %v604_v36 = vld [vmem:[#allocation8 + $0x1f0] sm:$0xff] }
  0xc8   : > { %1018 = vmatprep.subr.bf16.mxu1 %v1017_v9  ;;  %v587_v9 = vld [vmem:[#allocation8 + $0x168] sm:$0xff]  ;;  %v1123_v13 = vpack.c.bf16 %v584_v6, %v582_v5  ;;  %v347_v5 = vld [vmem:[#allocation7 + $0x2d0] sm:$0xff] }
  0xc9   : > { %v1125_v16 = vpack.c.bf16 %v589_v10, %v587_v9  ;;  %v351_v6 = vld [vmem:[#allocation7 + $0x2f0] sm:$0xff] }
  0xca   : > { %453 = vmatmul.mubr.f32.vlgmr.msra.gmra.mrb[0].mxu1 %v1723_v41  ;;  %v1063_v9 = vpack.c.bf16 %v351_v6, %v347_v5 }
  0xcb   : > { %1020 = vmatpush1.bf16.msra.mxu1 %v1019_v17  ;;  %523 = vmatprep.mubr.f32.mxu1 %v1727_v44  ;;  %v576_v44 = vld [vmem:[#allocation8 + $0x110] sm:$0xff]  ;;  %v586_v17 = vld [vmem:[#allocation8 + $0x160] sm:$0xff] }
  0xcc   : > { %1022 = vmatprep.subr.bf16.mxu1 %v1021_v21  ;;  %v1115_v53 = vpack.c.bf16 %v576_v44, %v574_v46  ;;  %v591_v21 = vld [vmem:[#allocation8 + $0x188] sm:$0xff]  ;;  %v1127_v25 = vpack.c.bf16 %v588_v18, %v586_v17  ;;  %v327_v46 = vld [vmem:[#allocation7 + $0x230] sm:$0xff] }
  0xcd   : > { %v1129_v28 = vpack.c.bf16 %v593_v22, %v591_v21  ;;  %v599_v44 = vld [vmem:[#allocation8 + $0x1c8] sm:$0xff]  ;;  %v1051_v51 = vpack.c.bf16 %v327_v46, %v323_v39  ;;  %v363_v17 = vld [vmem:[#allocation7 + $0x350] sm:$0xff]  ;;  %v609_v39 = vld [vmem:[#allocation8 + $0x218] sm:$0xff] }
  0xce   : > { %1116 = vmatpush1.bf16.msra.mxu0 %v1115_v53  ;;  %v598_v53 = vld [vmem:[#allocation8 + $0x1c0] sm:$0xff]  ;;  %v367_v18 = vld [vmem:[#allocation7 + $0x370] sm:$0xff] }
  0xcf   : > { %1024 = vmatpush1.bf16.msra.mxu1 %v1023_v29  ;;  %1118 = vmatprep.subr.bf16.mxu0 %v1117_v56  ;;  %v590_v29 = vld [vmem:[#allocation8 + $0x180] sm:$0xff]  ;;  %v331_v56 = vld [vmem:[#allocation7 + $0x250] sm:$0xff]  ;;  %v1071_v21 = vpack.c.bf16 %v367_v18, %v363_v17 }
  0xd0   : > { %1026 = vmatprep.subr.bf16.mxu1 %v1025_v34  ;;  %v597_v34 = vld [vmem:[#allocation8 + $0x1b8] sm:$0xff]  ;;  %v1131_v37 = vpack.c.bf16 %v592_v30, %v590_v29  ;;  %v1055_v61 = vpack.c.bf16 %v335_v57, %v331_v56  ;;  %v379_v29 = vld [vmem:[#allocation7 + $0x3d0] sm:$0xff] }
  0xd1   : > { %v1133_v40 = vpack.c.bf16 %v597_v34, %v595_v33  ;;  %v383_v30 = vld [vmem:[#allocation7 + $0x3f0] sm:$0xff]  ;;  %v605_v33 = vld [vmem:[#allocation8 + $0x1f8] sm:$0xff] }
  0xd2   : > { %1120 = vmatpush1.bf16.msra.mxu0 %v1119_v1  ;;  %v348_v1 = vld [vmem:[#allocation7 + $0x2d8] sm:$0xff]  ;;  %v1141_v34 = vpack.c.bf16 %v605_v33, %v603_v32  ;;  %v608_v46 = vld [vmem:[#allocation8 + $0x210] sm:$0xff]  ;;  %v643_v33 = vld [vmem:[#allocation8 + $0x328] sm:$0xff] }
  0xd3   : > { %1028 = vmatpush1.bf16.msra.mxu1 %v1027_v42  ;;  %1122 = vmatprep.subr.bf16.mxu0 %v1121_v4  ;;  %v594_v42 = vld [vmem:[#allocation8 + $0x1a0] sm:$0xff]  ;;  %v617_v56 = vld [vmem:[#allocation8 + $0x258] sm:$0xff]  ;;  %v640_v32 = vld [vmem:[#allocation8 + $0x310] sm:$0xff] }
  0xd4   : > { %1030 = vmatprep.subr.bf16.mxu1 %v1029_v47  ;;  %v601_v47 = vld [vmem:[#allocation8 + $0x1d8] sm:$0xff]  ;;  %v1135_v50 = vpack.c.bf16 %v596_v43, %v594_v42  ;;  %v530_v42 = vld [vmem:[#allocation5] sm:$0xff] }
  0xd5   : > { %v1137_v52 = vpack.c.bf16 %v601_v47, %v599_v44  ;;  %v534_v43 = vcombine.high %v530_v42, %v530_v42  ;;  %v611_v47 = vld [vmem:[#allocation8 + $0x228] sm:$0xff] }
  0xd6   : > { %1124 = vmatpush1.bf16.msra.mxu0 %v1123_v13  ;;  %v364_v13 = vld [vmem:[#allocation7 + $0x358] sm:$0xff] }
  0xd7   : > { %1032 = vmatpush1.bf16.msra.mxu1 %v1031_v54  ;;  %1126 = vmatprep.subr.bf16.mxu0 %v1125_v16  ;;  %v600_v54 = vld [vmem:[#allocation8 + $0x1d0] sm:$0xff] }
  0xd8   : > { %1034 = vmatprep.subr.bf16.mxu1 %v1033_v59  ;;  %v344_v59 = vld [vmem:[#allocation7 + $0x2b8] sm:$0xff]  ;;  %v1139_v60 = vpack.c.bf16 %v600_v54, %v598_v53  ;;  %v610_v53 = vld [vmem:[#allocation8 + $0x220] sm:$0xff]  ;;  %v612_v54 = vld [vmem:[#allocation8 + $0x230] sm:$0xff] }
  0xd9   : > { %v1057_v62 = vpack.c.bf16 %v344_v59, %v340_v58  ;;  %v1151_v57 = vpack.c.bf16 %v612_v54, %v610_v53  ;;  %v614_v59 = vld [vmem:[#allocation8 + $0x240] sm:$0xff] }
  0xda   : > { %1128 = vmatpush1.bf16.msra.mxu0 %v1127_v25  ;;  %v380_v25 = vld [vmem:[#allocation7 + $0x3d8] sm:$0xff] }
  0xdb   : > { %1036 = vmatpush1.bf16.msra.mxu1 %v1035_v2  ;;  %1130 = vmatprep.subr.bf16.mxu0 %v1129_v28  ;;  %v352_v2 = vld [vmem:[#allocation7 + $0x2f8] sm:$0xff] }
  0xdc   : > { %1038 = vmatprep.subr.bf16.mxu1 %v1037_v7  ;;  %v1061_v4 = vpack.c.bf16 %v352_v2, %v348_v1  ;;  %v356_v7 = vld [vmem:[#allocation7 + $0x318] sm:$0xff]  ;;  %v618_v1 = vld [vmem:[#allocation8 + $0x260] sm:$0xff]  ;;  %v620_v2 = vld [vmem:[#allocation8 + $0x270] sm:$0xff] }
  0xdd   : > { %v1065_v10 = vpack.c.bf16 %v360_v8, %v356_v7  ;;  %v1159_v5 = vpack.c.bf16 %v620_v2, %v618_v1  ;;  %v622_v7 = vld [vmem:[#allocation8 + $0x280] sm:$0xff]  ;;  %v624_v8 = vld [vmem:[#allocation8 + $0x290] sm:$0xff] }
  0xde   : > { %1132 = vmatpush1.bf16.msra.mxu0 %v1131_v37  ;;  %v1143_v37 = vpack.c.bf16 %v604_v36, %v602_v35  ;;  %v1163_v11 = vpack.c.bf16 %v624_v8, %v622_v7  ;;  %v531_v8 = vld [vmem:[#allocation5 + $0x8] sm:$0xff] }
  0xdf   : > { %1040 = vmatpush1.bf16.msra.mxu1 %v1039_v14  ;;  %1134 = vmatprep.subr.bf16.mxu0 %v1133_v40  ;;  %v368_v14 = vld [vmem:[#allocation7 + $0x378] sm:$0xff] }
  0xe0   : > { %1042 = vmatprep.subr.bf16.mxu1 %v1041_v19  ;;  %v1069_v16 = vpack.c.bf16 %v368_v14, %v364_v13  ;;  %v372_v19 = vld [vmem:[#allocation7 + $0x398] sm:$0xff]  ;;  %v626_v13 = vld [vmem:[#allocation8 + $0x2a0] sm:$0xff]  ;;  %v628_v14 = vld [vmem:[#allocation8 + $0x2b0] sm:$0xff] }
  0xe1   : > { %v1073_v22 = vpack.c.bf16 %v376_v20, %v372_v19  ;;  %v1167_v17 = vpack.c.bf16 %v628_v14, %v626_v13  ;;  %v630_v19 = vld [vmem:[#allocation8 + $0x2c0] sm:$0xff]  ;;  %v632_v20 = vld [vmem:[#allocation8 + $0x2d0] sm:$0xff] }
  0xe2   : > { %1136 = vmatpush1.bf16.msra.mxu0 %v1135_v50  ;;  %v1171_v23 = vpack.c.bf16 %v632_v20, %v630_v19 }
  0xe3   : > { %1044 = vmatpush1.bf16.msra.mxu1 %v1043_v26  ;;  %1138 = vmatprep.subr.bf16.mxu0 %v1137_v52  ;;  %v384_v26 = vld [vmem:[#allocation7 + $0x3f8] sm:$0xff]  ;;  %v1149_v52 = vpack.c.bf16 %v613_v48, %v611_v47 }
  0xe4   : > { %1046 = vmatprep.subr.bf16.mxu1 %v1045_v31  ;;  %v1077_v28 = vpack.c.bf16 %v384_v26, %v380_v25  ;;  %v1079_v31 = vpack.c.bf16 %v383_v30, %v379_v29  ;;  %v634_v25 = vld [vmem:[#allocation8 + $0x2e0] sm:$0xff]  ;;  %v636_v26 = vld [vmem:[#allocation8 + $0x2f0] sm:$0xff]  ;;  %v653_v47 = vld [vmem:[#allocation8 + $0x378] sm:$0xff] }
  0xe5   : > { %v1175_v29 = vpack.c.bf16 %v636_v26, %v634_v25 }
  0xe6   : > { %1140 = vmatpush1.bf16.msra.mxu0 %v1139_v60  ;;  %v616_v60 = vld [vmem:[#allocation8 + $0x250] sm:$0xff] }
  0xe7   : > { %1048 = vmatpush1.bf16.msra.mxu1 %v1047_v38  ;;  %1142 = vmatprep.subr.bf16.mxu0 %v1141_v34  ;;  %v607_v38 = vld [vmem:[#allocation8 + $0x208] sm:$0xff]  ;;  %v1155_v63 = vpack.c.bf16 %v616_v60, %v614_v59  ;;  %v645_v34 = vld [vmem:[#allocation8 + $0x338] sm:$0xff] }
  0xe8   : > { %1050 = vmatprep.subr.bf16.mxu1 %v1049_v45  ;;  %v1145_v40 = vpack.c.bf16 %v609_v39, %v607_v38  ;;  %v606_v45 = vld [vmem:[#allocation8 + $0x200] sm:$0xff]  ;;  %v1181_v36 = vpack.c.bf16 %v645_v34, %v643_v33  ;;  %v644_v38 = vld [vmem:[#allocation8 + $0x330] sm:$0xff]  ;;  %v647_v39 = vld [vmem:[#allocation8 + $0x348] sm:$0xff] }
  0xea   : > { %1144 = vmatpush1.bf16.msra.mxu0 %v1143_v37  ;;  %v642_v37 = vld [vmem:[#allocation8 + $0x320] sm:$0xff] }
  0xeb   : > { %1052 = vmatpush1.bf16.msra.mxu1 %v1051_v51  ;;  %1146 = vmatprep.subr.bf16.mxu0 %v1145_v40  ;;  %v1147_v51 = vpack.c.bf16 %v608_v46, %v606_v45  ;;  %v649_v40 = vld [vmem:[#allocation8 + $0x358] sm:$0xff]  ;;  %v646_v45 = vld [vmem:[#allocation8 + $0x340] sm:$0xff]  ;;  %v648_v46 = vld [vmem:[#allocation8 + $0x350] sm:$0xff] }
  0xec   : > { %1054 = vmatprep.subr.bf16.mxu1 %v1053_v55  ;;  %v615_v55 = vld [vmem:[#allocation8 + $0x248] sm:$0xff]  ;;  %v1187_v48 = vpack.c.bf16 %v648_v46, %v646_v45 }
  0xed   : > { %v1153_v58 = vpack.c.bf16 %v617_v56, %v615_v55  ;;  %v654_v55 = vld [vmem:[#allocation8 + $0x380] sm:$0xff]  ;;  %v656_v56 = vld [vmem:[#allocation8 + $0x390] sm:$0xff] }
  0xee   : > { %v1195_v59 = vpack.c.bf16 %v656_v56, %v654_v55 }
  0xef   : > { %1056 = vmatpush1.bf16.msra.mxu1 %v1055_v61  ;;  %v619_v61 = vld [vmem:[#allocation8 + $0x268] sm:$0xff] }
  0xf0   : > { %1058 = vmatprep.subr.bf16.mxu1 %v1057_v62  ;;  %v621_v62 = vld [vmem:[#allocation8 + $0x278] sm:$0xff] }
  0xf1   : > { %v1157_v0 = vpack.c.bf16 %v621_v62, %v619_v61  ;;  %v658_v61 = vld [vmem:[#allocation8 + $0x3a0] sm:$0xff]  ;;  %v660_v62 = vld [vmem:[#allocation8 + $0x3b0] sm:$0xff] }
  0xf2   : > { %v1199_v1 = vpack.c.bf16 %v660_v62, %v658_v61 }
  0xf3   : > { %1060 = vmatpush1.bf16.msra.mxu1 %v1059_v3  ;;  %v623_v3 = vld [vmem:[#allocation8 + $0x288] sm:$0xff] }
  0xf4   : > { %1062 = vmatprep.subr.bf16.mxu1 %v1061_v4  ;;  %v625_v4 = vld [vmem:[#allocation8 + $0x298] sm:$0xff] }
  0xf5   : > { %v1161_v6 = vpack.c.bf16 %v625_v4, %v623_v3  ;;  %v662_v3 = vld [vmem:[#allocation8 + $0x3c0] sm:$0xff]  ;;  %v664_v4 = vld [vmem:[#allocation8 + $0x3d0] sm:$0xff] }
  0xf6   : > { %v1203_v7 = vpack.c.bf16 %v664_v4, %v662_v3 }
  0xf7   : > { %1064 = vmatpush1.bf16.msra.mxu1 %v1063_v9  ;;  %v627_v9 = vld [vmem:[#allocation8 + $0x2a8] sm:$0xff] }
  0xf8   : > { %1066 = vmatprep.subr.bf16.mxu1 %v1065_v10  ;;  %v629_v10 = vld [vmem:[#allocation8 + $0x2b8] sm:$0xff] }
  0xf9   : > { %v1165_v12 = vpack.c.bf16 %v629_v10, %v627_v9  ;;  %v666_v10 = vld [vmem:[#allocation8 + $0x3e0] sm:$0xff] }
  0xfb   : > { %1068 = vmatpush1.bf16.msra.mxu1 %v1067_v15  ;;  %v631_v15 = vld [vmem:[#allocation8 + $0x2c8] sm:$0xff] }
  0xfc   : > { %1070 = vmatprep.subr.bf16.mxu1 %v1069_v16  ;;  %v633_v16 = vld [vmem:[#allocation8 + $0x2d8] sm:$0xff] }
  0xfd   : > { %v1169_v18 = vpack.c.bf16 %v633_v16, %v631_v15 }
  0xff   : > { %1072 = vmatpush1.bf16.msra.mxu1 %v1071_v21  ;;  %v635_v21 = vld [vmem:[#allocation8 + $0x2e8] sm:$0xff] }
 0x100   : > { %1074 = vmatprep.subr.bf16.mxu1 %v1073_v22  ;;  %v637_v22 = vld [vmem:[#allocation8 + $0x2f8] sm:$0xff] }
 0x101   : > { %v1173_v24 = vpack.c.bf16 %v637_v22, %v635_v21 }
 0x103   : > { %1076 = vmatpush1.bf16.msra.mxu1 %v1075_v27  ;;  %v639_v27 = vld [vmem:[#allocation8 + $0x308] sm:$0xff] }
 0x104   : > { %1078 = vmatprep.subr.bf16.mxu1 %v1077_v28  ;;  %v641_v28 = vld [vmem:[#allocation8 + $0x318] sm:$0xff] }
 0x105   : > { %v1177_v30 = vpack.c.bf16 %v641_v28, %v639_v27 }
 0x107   : > { %1080 = vmatpush1.bf16.msra.mxu1 %v1079_v31  ;;  %v638_v31 = vld [vmem:[#allocation8 + $0x300] sm:$0xff] }
 0x108   : > { %v1179_v35 = vpack.c.bf16 %v640_v32, %v638_v31 }
 0x10a   : > { %524 = vmatmul.mubr.f32.vlgmr.msra.gmra.mrb[2].mxu1 %v1723_v41 }
 0x19d   : > { %v454_v44 = vpop.f32.mrb[0].mxu1 }
 0x19e   : > { %v538_v41 = vmul.f32 %v530_v42, %v454_v44  ;;  %v456_v49 = vpop.f32.mrb[1].mxu1  ;;  %v1183_v42 = vpack.c.bf16 %v644_v38, %v642_v37  ;;  %v651_v44 = vld [vmem:[#allocation8 + $0x368] sm:$0xff] }
 0x19f   : > { %v539_v50 = vmul.f32 %v534_v43, %v456_v49  ;;  %v1185_v43 = vpack.c.bf16 %v649_v40, %v647_v39  ;;  %v650_v49 = vld [vmem:[#allocation8 + $0x360] sm:$0xff] }
 0x1a1   : > { %734 = vmatprep.mubr.f32.mxu0 %v539_v50  ;;  %v652_v50 = vld [vmem:[#allocation8 + $0x370] sm:$0xff] }
 0x1a2   : > { %735 = vmatmul.mubr.f32.vlgmr.msra.gmra.mrb[0].mxu0 %v538_v41  ;;  %v1189_v41 = vpack.c.bf16 %v653_v47, %v651_v44  ;;  %v1191_v53 = vpack.c.bf16 %v652_v50, %v650_v49 }
 0x1a3   : > { %1148 = vmatpush1.bf16.msra.mxu0 %v1147_v51  ;;  %v655_v51 = vld [vmem:[#allocation8 + $0x388] sm:$0xff] }
 0x1a4   : > { %1150 = vmatprep.subr.bf16.mxu0 %v1149_v52  ;;  %v657_v52 = vld [vmem:[#allocation8 + $0x398] sm:$0xff] }
 0x1a5   : > { %v1193_v54 = vpack.c.bf16 %v657_v52, %v655_v51 }
 0x1a7   : > { %1152 = vmatpush1.bf16.msra.mxu0 %v1151_v57  ;;  %v659_v57 = vld [vmem:[#allocation8 + $0x3a8] sm:$0xff] }
 0x1a8   : > { %1154 = vmatprep.subr.bf16.mxu0 %v1153_v58  ;;  %v661_v58 = vld [vmem:[#allocation8 + $0x3b8] sm:$0xff] }
 0x1a9   : > { %v1197_v60 = vpack.c.bf16 %v661_v58, %v659_v57 }
 0x1ab   : > { %1156 = vmatpush1.bf16.msra.mxu0 %v1155_v63  ;;  %v663_v63 = vld [vmem:[#allocation8 + $0x3c8] sm:$0xff] }
 0x1ac   : > { %1158 = vmatprep.subr.bf16.mxu0 %v1157_v0  ;;  %v665_v0 = vld [vmem:[#allocation8 + $0x3d8] sm:$0xff] }
 0x1ad   : > { %v1201_v2 = vpack.c.bf16 %v665_v0, %v663_v63 }
 0x1af   : > { %1160 = vmatpush1.bf16.msra.mxu0 %v1159_v5  ;;  %v667_v5 = vld [vmem:[#allocation8 + $0x3e8] sm:$0xff] }
 0x1b0   : > { %1162 = vmatprep.subr.bf16.mxu0 %v1161_v6  ;;  %v669_v6 = vld [vmem:[#allocation8 + $0x3f8] sm:$0xff] }
 0x1b1   : > { %v1205_v9 = vpack.c.bf16 %v669_v6, %v667_v5 }
 0x1b3   : > { %1164 = vmatpush1.bf16.msra.mxu0 %v1163_v11  ;;  %v668_v11 = vld [vmem:[#allocation8 + $0x3f0] sm:$0xff] }
 0x1b4   : > { %1166 = vmatprep.subr.bf16.mxu0 %v1165_v12  ;;  %v535_v12 = vcombine.high %v531_v8, %v531_v8  ;;  %v1207_v13 = vpack.c.bf16 %v668_v11, %v666_v10 }
 0x1b7   : > { %1168 = vmatpush1.bf16.msra.mxu0 %v1167_v17 }
 0x1b8   : > { %1170 = vmatprep.subr.bf16.mxu0 %v1169_v18 }
 0x1bb   : > { %1172 = vmatpush1.bf16.msra.mxu0 %v1171_v23 }
 0x1bc   : > { %1174 = vmatprep.subr.bf16.mxu0 %v1173_v24 }
 0x1bf   : > { %1176 = vmatpush1.bf16.msra.mxu0 %v1175_v29 }
 0x1c0   : > { %1178 = vmatprep.subr.bf16.mxu0 %v1177_v30 }
 0x1c3   : > { %1180 = vmatpush1.bf16.msra.mxu0 %v1179_v35 }
 0x1c4   : > { %1182 = vmatprep.subr.bf16.mxu0 %v1181_v36 }
 0x1c7   : > { %1184 = vmatpush1.bf16.msra.mxu0 %v1183_v42 }
 0x1c8   : > { %1186 = vmatprep.subr.bf16.mxu0 %v1185_v43 }
 0x1cb   : > { %1188 = vmatpush1.bf16.msra.mxu0 %v1187_v48 }
 0x1cc   : > { %1190 = vmatprep.subr.bf16.mxu0 %v1189_v41 }
 0x1cf   : > { %1192 = vmatpush1.bf16.msra.mxu0 %v1191_v53 }
 0x1d0   : > { %1194 = vmatprep.subr.bf16.mxu0 %v1193_v54 }
 0x1d3   : > { %1196 = vmatpush1.bf16.msra.mxu0 %v1195_v59 }
 0x1d4   : > { %1198 = vmatprep.subr.bf16.mxu0 %v1197_v60 }
 0x1d7   : > { %1200 = vmatpush1.bf16.msra.mxu0 %v1199_v1 }
 0x1d8   : > { %1202 = vmatprep.subr.bf16.mxu0 %v1201_v2 }
 0x1db   : > { %1204 = vmatpush1.bf16.msra.mxu0 %v1203_v7 }
 0x1dc   : > { %1206 = vmatprep.subr.bf16.mxu0 %v1205_v9 }
 0x1dd   : > { %v525_v14 = vpop.f32.mrb[2].mxu1 }
 0x1de   : > { %v527_v15 = vpop.f32.mrb[3].mxu1  ;;  %v540_v17 = vmul.f32 %v531_v8, %v525_v14 }
 0x1df   : > { %v541_v16 = vmul.f32 %v535_v12, %v527_v15  ;;  %1208 = vmatpush1.bf16.msra.mxu0 %v1207_v13 }
 0x1e1   : > { %805 = vmatprep.mubr.f32.mxu0 %v541_v16 }
 0x1e2   : > { %806 = vmatmul.mubr.f32.vlgmr.msra.gmra.mrb[0].mxu0 %v540_v17 }
 0x2b5   : > { %v807_v18 = vpop.f32.mrb[0].mxu0 }
 0x2b6   : > { %v809_v19 = vpop.f32.mrb[1].mxu0 }
 0x2b7   : > { %v814_v20 = vcombine.low %v807_v18, %v809_v19 }
 0x2b9   : > { %816 = vst [vmem:[%s255_s23] sm:$0xff] %v814_v20 }
 0x2ba   : > { %1422 = shalt.err (!%p1419_p13)
}
 0x2bb   : > { %s1423_s30 = scalar_lea.hbm %s1739_s27, 128  ;;  %s1427_s5 = scalar_lea.hbm %s1787_s4, 256 }
 0x2bc   : > { %p1424_p5 = scmp.ne.s32.totalorder %s1739_s27, %s1423_s30  ;;  %p1428_p9 = scmp.lt.u32.totalorder %s1739_s27, %s1787_s4 }
 0x2bd   : > { %p1429_p12 = scmp.lt.u32.totalorder %s1427_s5, %s1423_s30  ;;  %p1431_p1 = scmp.lt.u32.totalorder %s1423_s30, %s1739_s27 }
 0x2be   : > { %p1425_p0 = pnand %p1424_p5, %p1657_p6 }
 0x2bf   : > { %p1430_p2 = por %p1429_p12, %p1428_p9 }
 0x2c0   : > { %p1426_p11 = pneg %p1425_p0 }
 0x2c1   : > { %p1432_p4 = por %p1431_p1, %p1430_p2 }
 0x2c3   : > { %p1433_p8 = pnand %p1432_p4, %p1426_p11 }
 0x2c5   : > { %1436 = shalt.err (!%p1433_p8)
}
 0x2c6   : > { %1225 = dma.vmem_to_hbm [thread:$0]  (%p1657_p6), %s1741_s29, 128, %s1739_s27, %s818_s11  }
 0x2c7 PF: > { %s844_s25 = sand.u32 1, %s1471_s15   ;;  %p1805_p3 = scmp.ne.s32.totalorder %s1792_s22, 0 }
 0x2c8   : > { %p1806_p7 = scmp.ge.s32.totalorder %s1483_s18, 2  ;;  %s845_s21 = scalar_lea.sflag [#allocation4], %s844_s25 }
 0x2ca   : > { %p1242_p10 = pnand %p1806_p7, %p1805_p3 }
 0x2cc   : > { %1466 = dma.done.wait (!%p1242_p10), %s845_s21, 128  }
 0x2cd   : > { %1468 = vsyncadd (!%p1242_p10), %s845_s21, 4294967168  ;;  %p19_p13 = scmp.ge.s32.totalorder %s1643_s9, 4   ;;  %s1807_s15 = smov %s1475_s16 }
 0x2ce   : > { %s1808_s16 = smov %s1479_s17  ;;  %s1809_s17 = smov %s1653_s13 }
 0x2cf   : > { %s1810_s18 = smov %s1643_s9  ;;  %21 = sbr.rel (!%p19_p13) target bundleno = 7 (0x7), region = 93 }
 0x2d6   :  { %850 = vsyncpa [#allocation3], 1 }
 0x2d7   :  { %852 = vsyncpa [#allocation3 + $0x1], 1 }
 0x2d8   :  { %853 = vsyncpa [#allocation6], 1 }
 0x2d9   :  { %854 = vsyncpa [#allocation9], 1 }
 0x2da   :  { %855 = vsyncpa [#allocation4], 1 }
 0x2db   :  { %857 = vsyncpa [#allocation4 + $0x1], 1 }

</bundles_post_ra>
